<compile_context>
chip_gen: v6e
topology: v6e:2x2x1
jax: 0.10.0
libtpu: 0.0.40
codegen_flags: <defaults>
</compile_context>

<pallas_src>
import functools
import math

import numpy as np
import jax
import jax.numpy as jnp
from jax import lax
from jax.experimental import pallas as pl
from jax.experimental.pallas import tpu as pltpu


# ----------------------------------------------------------------------------
# DCT filter bank (direct port of dct_filters, use_bn=False configuration:
# groups=1, expand_dim=0 -> effective basis shape (nf, k, k)).
# ----------------------------------------------------------------------------
def dct_filter_bank(k=3, level=None, DC=True, l1_norm=True):
    if level is None:
        nf = k ** 2 - int(not DC)
    elif level <= k:
        nf = level * (level + 1) // 2 - int(not DC)
    else:
        r = 2 * k - 1 - level
        nf = k ** 2 - r * (r + 1) // 2 - int(not DC)
    filter_bank = np.zeros((nf, k, k), dtype=np.float32)
    m = 0
    for i in range(k):
        for j in range(k):
            if (not DC and i == 0 and j == 0) or (level is not None and i + j >= level):
                continue
            for x in range(k):
                for y in range(k):
                    filter_bank[m, x, y] = (
                        math.cos(math.pi * (x + 0.5) * i / k)
                        * math.cos(math.pi * (y + 0.5) * j / k)
                    )
            if l1_norm:
                filter_bank[m, :, :] /= np.sum(np.abs(filter_bank[m, :, :]))
            else:
                ai = 1.0 if i > 0 else 1.0 / math.sqrt(2.0)
                aj = 1.0 if j > 0 else 1.0 / math.sqrt(2.0)
                filter_bank[m, :, :] *= 2.0 / k * ai * aj
            m += 1
    return jnp.asarray(filter_bank)  # (nf, k, k)


# ----------------------------------------------------------------------------
# Pallas kernel: fused im2col + matmul + bias for one batch element.
# ----------------------------------------------------------------------------
def _harm_conv_kernel(x_ref, w_ref, b_ref, o_ref, *, k, dilation, wp, l_out):
    """
    x_ref: (1, Cin, Hp*Wp)   bf16  padded input image, spatial flattened
    w_ref: (k*k, Cout, Cin)  bf16  DCT-combined conv filters, tap-major
    b_ref: (Cout, 1)         f32   bias
    o_ref: (1, Cout, Lout)   f32   stride-1 conv outputs over flat positions
    """
    xf = x_ref[0]                                     # (Cin, Hp*Wp) in VMEM
    cout = o_ref.shape[1]
    acc = jnp.zeros((cout, l_out), jnp.float32)
    # Static unroll over the k*k taps; each shifted window is a static slice of
    # the flat image (im2col in VMEM -- never materialised in HBM).
    for kh in range(k):
        for kw in range(k):
            s0 = kh * dilation * wp + kw * dilation
            win = xf[:, s0:s0 + l_out]                # (Cin, Lout)
            acc = acc + jnp.dot(
                w_ref[kh * k + kw], win,              # (Cout, Cin) @ (Cin, Lout)
                preferred_element_type=jnp.float32,
            )
    o_ref[0] = acc + b_ref[...]                       # lane-dense f32 store


# ----------------------------------------------------------------------------
# Host-side wrapper
# ----------------------------------------------------------------------------
def harm2d_forward(x, weight, bias, dct_bank, *, stride=1, padding=0, dilation=1):
    """Harm2d forward (use_bn=False, groups=1 branch).

    x:        (N, Cin, H, W)     float32 (NCHW, like the PyTorch module)
    weight:   (Cout, Cin, nf)    float32 (trailing (1,1) dims of torch param squeezed)
    bias:     (Cout,)            float32
    dct_bank: (nf, k, k)         float32
    returns:  (N, Cout, OH, OW)  float32
    """
    # TODO(synk): groups > 1 and the use_bn=True (depthwise DCT + BatchNorm +
    #             1x1 conv) branch are not implemented; default config uses this branch.
    no, ni, nf = weight.shape
    k = dct_bank.shape[-1]
    N, C, H, W = x.shape
    assert C == ni

    # --- DCT-basis combine in plain JAX (tiny; XLA fuses it) ------------------
    filt = jnp.einsum("oif,fxy->oixy", weight, dct_bank)           # (no, ni, k, k)
    w_taps = filt.transpose(2, 3, 0, 1).reshape(k * k, no, ni)     # tap-major
    w_taps = w_taps.astype(jnp.bfloat16)

    # --- pad spatially (conv padding) and flatten spatial ---------------------
    k_eff = (k - 1) * dilation + 1
    hp, wp = H + 2 * padding, W + 2 * padding
    oh = (hp - k_eff) // stride + 1
    ow = (wp - k_eff) // stride + 1
    x_pad = jnp.pad(x, ((0, 0), (0, 0), (padding, padding), (padding, padding)))
    x_flat = x_pad.reshape(N, ni, hp * wp).astype(jnp.bfloat16)
    l_in = hp * wp
    # Stride-1 output positions computed by the kernel; strided outputs are
    # gathered from them afterwards.
    # TODO(synk): for stride > 1 this recomputes ~stride^2 extra positions;
    #             HResNet's common config (stride=1) pays nothing.
    l_out = (oh - 1) * stride * wp + (ow - 1) * stride + 1

    bias2 = bias.reshape(no, 1).astype(jnp.float32)

    # --- VMEM budget (double-buffered blocks + resident weights), v7x-safe ----
    step_bytes = (2 * ni * l_in * 2) + (2 * no * l_out * 4) + (k * k * no * ni * 2) + no * 4
    vmem_limit = int(min(48 * 2 ** 20, max(8 * 2 ** 20, 8 * step_bytes)))

    flops = 2 * N * no * ni * k * k * l_out
    bytes_accessed = N * ni * l_in * 2 + k * k * no * ni * 2 + no * 4 + N * no * l_out * 4

    # TODO(synk): for very large Cin or very large images, add a Cin ("arbitrary")
    #             grid axis with a VMEM accumulator / halo-aware spatial tiling.
    out_flat = pl.pallas_call(
        functools.partial(_harm_conv_kernel, k=k, dilation=dilation, wp=wp, l_out=l_out),
        out_shape=jax.ShapeDtypeStruct((N, no, l_out), jnp.float32),
        grid=(N,),
        in_specs=[
            pl.BlockSpec((1, ni, l_in), lambda n: (n, 0, 0)),      # per-image input
            pl.BlockSpec((k * k, no, ni), lambda n: (0, 0, 0)),    # resident weights
            pl.BlockSpec((no, 1), lambda n: (0, 0)),               # resident bias
        ],
        out_specs=pl.BlockSpec((1, no, l_out), lambda n: (n, 0, 0)),
        compiler_params=pltpu.CompilerParams(
            dimension_semantics=("parallel",),                     # megacore over batch
            vmem_limit_bytes=vmem_limit,
        ),
        cost_estimate=pl.CostEstimate(
            flops=flops, transcendentals=0, bytes_accessed=bytes_accessed
        ),
    )(x_flat, w_taps, bias2)

    # Select the (strided) valid output positions; result is already NCHW,
    # so no transpose is needed.
    pos = (jnp.arange(oh) * (stride * wp))[:, None] + (jnp.arange(ow) * stride)[None, :]
    y = jnp.take(out_flat, pos.reshape(-1), axis=2).reshape(N, no, oh, ow)
    return y


# ----------------------------------------------------------------------------
# Main: deterministic params, small shapes, reference check.
# ----------------------------------------------------------------------------
if __name__ == "__main__":
    # Module config: Harm2d(ni=4, no=8, kernel_size=3, stride=1, padding=1, bias=True)
    ni, no, k = 4, 8, 3
    stride, padding, dilation = 1, 1, 1

    dct_bank = dct_filter_bank(k=k)            # (nf, k, k), nf = 9
    nf = dct_bank.shape[0]

    key = jax.random.PRNGKey(0)
    key_w, key_x = jax.random.split(key)
    # kaiming_normal_(mode='fan_out', relu) on torch shape (no, ni, nf, 1, 1):
    # fan_out = no * nf, std = sqrt(2 / fan_out)
    std = math.sqrt(2.0 / (no * nf))
    weight = jax.random.normal(key_w, (no, ni, nf), dtype=jnp.float32) * std
    bias = jnp.zeros((no,), dtype=jnp.float32)

    x = jax.random.normal(key_x, (2, ni, 16, 16), dtype=jnp.float32)

    y = harm2d_forward(x, weight, bias, dct_bank,
                       stride=stride, padding=padding, dilation=dilation)
    y = jax.block_until_ready(y)

    # Pure-JAX f32 reference (same math as the PyTorch forward).
    filt_ref = jnp.einsum("oif,fxy->oixy", weight, dct_bank)
    y_ref = lax.conv_general_dilated(
        x, filt_ref,
        window_strides=(stride, stride),
        padding=[(padding, padding), (padding, padding)],
        rhs_dilation=(dilation, dilation),
        dimension_numbers=("NCHW", "OIHW", "NCHW"),
    ) + bias[None, :, None, None]

    assert y.shape == y_ref.shape == (2, no, 16, 16)
    # bf16 inputs (f32 accumulation) -> looser tolerance than the pure-f32 path.
    np.testing.assert_allclose(np.asarray(y), np.asarray(y_ref), rtol=2e-2, atol=2e-2)

    print("KERNEL_OK")
</pallas_src>

<mosaic_0001>
module attributes {stable_mosaic.version = 11 : i64} {
  func.func @_harm_conv_kernel(%arg0: i32, %arg1: memref<1x4x324xbf16, #tpu.memory_space<vmem>>, %arg2: memref<9x8x4xbf16, #tpu.memory_space<vmem>>, %arg3: memref<8x1xf32, #tpu.memory_space<vmem>>, %arg4: memref<1x8x286xf32, #tpu.memory_space<vmem>>) attributes {dimension_semantics = [#tpu.dimension_semantics<parallel>], iteration_bounds = array<i64: 2>, scalar_prefetch = 0 : i64, scratch_operands = 0 : i64, tpu.core_type = #tpu.core_type<tc>, window_params = [{transform_indices = @transform_0, window_bounds = array<i64: 1, 4, 324>}, {pipeline_mode = #tpu.pipeline_mode<synchronous>, transform_indices = @transform_1, window_bounds = array<i64: 9, 8, 4>}, {pipeline_mode = #tpu.pipeline_mode<synchronous>, transform_indices = @transform_2, window_bounds = array<i64: 8, 1>}, {transform_indices = @transform_3, window_bounds = array<i64: 1, 8, 286>}]} {
    %c0 = arith.constant 0 : index
    %c0_0 = arith.constant 0 : index
    %c0_1 = arith.constant 0 : index
    %0 = vector.load %arg1[%c0, %c0_0, %c0_1] : memref<1x4x324xbf16, #tpu.memory_space<vmem>>, vector<1x4x324xbf16>
    %1 = vector.shape_cast %0 : vector<1x4x324xbf16> to vector<4x324xbf16>
    %cst = arith.constant 0.000000e+00 : f32
    %2 = vector.broadcast %cst : f32 to vector<8x286xf32>
    %3 = vector.extract_strided_slice %1 {offsets = [0, 0], sizes = [4, 286], strides = [1, 1]} : vector<4x324xbf16> to vector<4x286xbf16>
    %c0_2 = arith.constant 0 : index
    %c0_3 = arith.constant 0 : index
    %c0_4 = arith.constant 0 : index
    %4 = vector.load %arg2[%c0_2, %c0_3, %c0_4] : memref<9x8x4xbf16, #tpu.memory_space<vmem>>, vector<1x8x4xbf16>
    %5 = vector.shape_cast %4 : vector<1x8x4xbf16> to vector<8x4xbf16>
    %cst_5 = arith.constant dense<0.000000e+00> : vector<8x286xf32>
    %6 = tpu.matmul %5, %3, %cst_5 {dimension_numbers = #tpu.dot_dimension_numbers<[1], [0], [0], [1], [0, 0, 1, 1], [], []>} : vector<8x4xbf16>, vector<4x286xbf16>, vector<8x286xf32> -> vector<8x286xf32>
    %7 = arith.addf %2, %6 : vector<8x286xf32>
    %8 = vector.extract_strided_slice %1 {offsets = [0, 1], sizes = [4, 286], strides = [1, 1]} : vector<4x324xbf16> to vector<4x286xbf16>
    %c1 = arith.constant 1 : index
    %c0_6 = arith.constant 0 : index
    %c0_7 = arith.constant 0 : index
    %9 = vector.load %arg2[%c1, %c0_6, %c0_7] : memref<9x8x4xbf16, #tpu.memory_space<vmem>>, vector<1x8x4xbf16>
    %10 = vector.shape_cast %9 : vector<1x8x4xbf16> to vector<8x4xbf16>
    %cst_8 = arith.constant dense<0.000000e+00> : vector<8x286xf32>
    %11 = tpu.matmul %10, %8, %cst_8 {dimension_numbers = #tpu.dot_dimension_numbers<[1], [0], [0], [1], [0, 0, 1, 1], [], []>} : vector<8x4xbf16>, vector<4x286xbf16>, vector<8x286xf32> -> vector<8x286xf32>
    %12 = arith.addf %7, %11 : vector<8x286xf32>
    %13 = vector.extract_strided_slice %1 {offsets = [0, 2], sizes = [4, 286], strides = [1, 1]} : vector<4x324xbf16> to vector<4x286xbf16>
    %c2 = arith.constant 2 : index
    %c0_9 = arith.constant 0 : index
    %c0_10 = arith.constant 0 : index
    %14 = vector.load %arg2[%c2, %c0_9, %c0_10] : memref<9x8x4xbf16, #tpu.memory_space<vmem>>, vector<1x8x4xbf16>
    %15 = vector.shape_cast %14 : vector<1x8x4xbf16> to vector<8x4xbf16>
    %cst_11 = arith.constant dense<0.000000e+00> : vector<8x286xf32>
    %16 = tpu.matmul %15, %13, %cst_11 {dimension_numbers = #tpu.dot_dimension_numbers<[1], [0], [0], [1], [0, 0, 1, 1], [], []>} : vector<8x4xbf16>, vector<4x286xbf16>, vector<8x286xf32> -> vector<8x286xf32>
    %17 = arith.addf %12, %16 : vector<8x286xf32>
    %18 = vector.extract_strided_slice %1 {offsets = [0, 18], sizes = [4, 286], strides = [1, 1]} : vector<4x324xbf16> to vector<4x286xbf16>
    %c3 = arith.constant 3 : index
    %c0_12 = arith.constant 0 : index
    %c0_13 = arith.constant 0 : index
    %19 = vector.load %arg2[%c3, %c0_12, %c0_13] : memref<9x8x4xbf16, #tpu.memory_space<vmem>>, vector<1x8x4xbf16>
    %20 = vector.shape_cast %19 : vector<1x8x4xbf16> to vector<8x4xbf16>
    %cst_14 = arith.constant dense<0.000000e+00> : vector<8x286xf32>
    %21 = tpu.matmul %20, %18, %cst_14 {dimension_numbers = #tpu.dot_dimension_numbers<[1], [0], [0], [1], [0, 0, 1, 1], [], []>} : vector<8x4xbf16>, vector<4x286xbf16>, vector<8x286xf32> -> vector<8x286xf32>
    %22 = arith.addf %17, %21 : vector<8x286xf32>
    %23 = vector.extract_strided_slice %1 {offsets = [0, 19], sizes = [4, 286], strides = [1, 1]} : vector<4x324xbf16> to vector<4x286xbf16>
    %c4 = arith.constant 4 : index
    %c0_15 = arith.constant 0 : index
    %c0_16 = arith.constant 0 : index
    %24 = vector.load %arg2[%c4, %c0_15, %c0_16] : memref<9x8x4xbf16, #tpu.memory_space<vmem>>, vector<1x8x4xbf16>
    %25 = vector.shape_cast %24 : vector<1x8x4xbf16> to vector<8x4xbf16>
    %cst_17 = arith.constant dense<0.000000e+00> : vector<8x286xf32>
    %26 = tpu.matmul %25, %23, %cst_17 {dimension_numbers = #tpu.dot_dimension_numbers<[1], [0], [0], [1], [0, 0, 1, 1], [], []>} : vector<8x4xbf16>, vector<4x286xbf16>, vector<8x286xf32> -> vector<8x286xf32>
    %27 = arith.addf %22, %26 : vector<8x286xf32>
    %28 = vector.extract_strided_slice %1 {offsets = [0, 20], sizes = [4, 286], strides = [1, 1]} : vector<4x324xbf16> to vector<4x286xbf16>
    %c5 = arith.constant 5 : index
    %c0_18 = arith.constant 0 : index
    %c0_19 = arith.constant 0 : index
    %29 = vector.load %arg2[%c5, %c0_18, %c0_19] : memref<9x8x4xbf16, #tpu.memory_space<vmem>>, vector<1x8x4xbf16>
    %30 = vector.shape_cast %29 : vector<1x8x4xbf16> to vector<8x4xbf16>
    %cst_20 = arith.constant dense<0.000000e+00> : vector<8x286xf32>
    %31 = tpu.matmul %30, %28, %cst_20 {dimension_numbers = #tpu.dot_dimension_numbers<[1], [0], [0], [1], [0, 0, 1, 1], [], []>} : vector<8x4xbf16>, vector<4x286xbf16>, vector<8x286xf32> -> vector<8x286xf32>
    %32 = arith.addf %27, %31 : vector<8x286xf32>
    %33 = vector.extract_strided_slice %1 {offsets = [0, 36], sizes = [4, 286], strides = [1, 1]} : vector<4x324xbf16> to vector<4x286xbf16>
    %c6 = arith.constant 6 : index
    %c0_21 = arith.constant 0 : index
    %c0_22 = arith.constant 0 : index
    %34 = vector.load %arg2[%c6, %c0_21, %c0_22] : memref<9x8x4xbf16, #tpu.memory_space<vmem>>, vector<1x8x4xbf16>
    %35 = vector.shape_cast %34 : vector<1x8x4xbf16> to vector<8x4xbf16>
    %cst_23 = arith.constant dense<0.000000e+00> : vector<8x286xf32>
    %36 = tpu.matmul %35, %33, %cst_23 {dimension_numbers = #tpu.dot_dimension_numbers<[1], [0], [0], [1], [0, 0, 1, 1], [], []>} : vector<8x4xbf16>, vector<4x286xbf16>, vector<8x286xf32> -> vector<8x286xf32>
    %37 = arith.addf %32, %36 : vector<8x286xf32>
    %38 = vector.extract_strided_slice %1 {offsets = [0, 37], sizes = [4, 286], strides = [1, 1]} : vector<4x324xbf16> to vector<4x286xbf16>
    %c7 = arith.constant 7 : index
    %c0_24 = arith.constant 0 : index
    %c0_25 = arith.constant 0 : index
    %39 = vector.load %arg2[%c7, %c0_24, %c0_25] : memref<9x8x4xbf16, #tpu.memory_space<vmem>>, vector<1x8x4xbf16>
    %40 = vector.shape_cast %39 : vector<1x8x4xbf16> to vector<8x4xbf16>
    %cst_26 = arith.constant dense<0.000000e+00> : vector<8x286xf32>
    %41 = tpu.matmul %40, %38, %cst_26 {dimension_numbers = #tpu.dot_dimension_numbers<[1], [0], [0], [1], [0, 0, 1, 1], [], []>} : vector<8x4xbf16>, vector<4x286xbf16>, vector<8x286xf32> -> vector<8x286xf32>
    %42 = arith.addf %37, %41 : vector<8x286xf32>
    %43 = vector.extract_strided_slice %1 {offsets = [0, 38], sizes = [4, 286], strides = [1, 1]} : vector<4x324xbf16> to vector<4x286xbf16>
    %c8 = arith.constant 8 : index
    %c0_27 = arith.constant 0 : index
    %c0_28 = arith.constant 0 : index
    %44 = vector.load %arg2[%c8, %c0_27, %c0_28] : memref<9x8x4xbf16, #tpu.memory_space<vmem>>, vector<1x8x4xbf16>
    %45 = vector.shape_cast %44 : vector<1x8x4xbf16> to vector<8x4xbf16>
    %cst_29 = arith.constant dense<0.000000e+00> : vector<8x286xf32>
    %46 = tpu.matmul %45, %43, %cst_29 {dimension_numbers = #tpu.dot_dimension_numbers<[1], [0], [0], [1], [0, 0, 1, 1], [], []>} : vector<8x4xbf16>, vector<4x286xbf16>, vector<8x286xf32> -> vector<8x286xf32>
    %47 = arith.addf %42, %46 : vector<8x286xf32>
    %c0_30 = arith.constant 0 : index
    %c0_31 = arith.constant 0 : index
    %48 = vector.load %arg3[%c0_30, %c0_31] : memref<8x1xf32, #tpu.memory_space<vmem>>, vector<8x1xf32>
    %49 = vector.broadcast %48 : vector<8x1xf32> to vector<8x286xf32>
    %50 = arith.addf %47, %49 : vector<8x286xf32>
    %c0_32 = arith.constant 0 : index
    %c0_33 = arith.constant 0 : index
    %c0_34 = arith.constant 0 : index
    %51 = vector.load %arg4[%c0_32, %c0_33, %c0_34] : memref<1x8x286xf32, #tpu.memory_space<vmem>>, vector<1x8x286xf32>
    %52 = vector.shape_cast %51 : vector<1x8x286xf32> to vector<8x286xf32>
    %53 = vector.shape_cast %50 : vector<8x286xf32> to vector<1x8x286xf32>
    tpu.vector_store %arg4[%c0_32, %c0_33, %c0_34], %53 {strides = array<i32>} : memref<1x8x286xf32, #tpu.memory_space<vmem>>, vector<1x8x286xf32>,
    return
  }
  func.func @transform_0(%arg0: i32) -> (i32, i32, i32) {
    %c0_i32 = arith.constant 0 : i32
    %c0_i32_0 = arith.constant 0 : i32
    %c0_i32_1 = arith.constant 0 : i32
    return %arg0, %c0_i32, %c0_i32_0 : i32, i32, i32
  }
  func.func @transform_1(%arg0: i32) -> (i32, i32, i32) {
    %c0_i32 = arith.constant 0 : i32
    %c0_i32_0 = arith.constant 0 : i32
    %c0_i32_1 = arith.constant 0 : i32
    %c0_i32_2 = arith.constant 0 : i32
    return %c0_i32, %c0_i32_0, %c0_i32_1 : i32, i32, i32
  }
  func.func @transform_2(%arg0: i32) -> (i32, i32) {
    %c0_i32 = arith.constant 0 : i32
    %c0_i32_0 = arith.constant 0 : i32
    %c0_i32_1 = arith.constant 0 : i32
    return %c0_i32, %c0_i32_0 : i32, i32
  }
  func.func @transform_3(%arg0: i32) -> (i32, i32, i32) {
    %c0_i32 = arith.constant 0 : i32
    %c0_i32_0 = arith.constant 0 : i32
    %c0_i32_1 = arith.constant 0 : i32
    return %arg0, %c0_i32, %c0_i32_0 : i32, i32, i32
  }
}

</mosaic_0001>

<bundles_post_ra>
// kernel: tpu_custom_call.1
= control target key start
LH: loop header
LB: loop body
LE: loop exit
PB: predicated region body
PF: predicated region fallthrough
CT: control target
= control target key end

     0   :  { %8 = vsyncpa [#allocation3], 0  ;;  %s1701_s0 = inlined_call_operand.vmem [shape: bf16[2,4,324], index: 0, kind: input, shape index: {}]   ;;  %s1702_s1 = inlined_call_operand.vmem [shape: bf16[9,8,4], index: 1, kind: input, shape index: {}]   ;;  %s1703_s2 = inlined_call_operand.vmem [shape: f32[8,1], index: 2, kind: input, shape index: {}]   ;;  %s1704_s3 = inlined_call_operand.hbm [shape: f32[2,8,286], index: 3, kind: output, shape index: {}]  }
   0x1   :  { %10 = vsyncpa [#allocation3 + $0x1], 0  ;;  %s1490_s12 = smov 0   ;;  %s1492_s13 = smov 0  }
   0x2   :  { %s1494_s14 = smov 0   ;;  %s1496_s15 = smov 0  }
   0x3 LB: > { %s1511_s16 = sadd.s32 4294967295, %s1455_s15   ;;  %s1224_s17 = sadd.s32 4294967294, %s1455_s15   ;;  %s1455_s15 = sphi %s1496_s15, %s1710_s15   ;;  %s1451_s14 = sphi %s1494_s14, %s1709_s14   ;;  %s1447_s13 = sphi %s1492_s13, %s1708_s13   ;;  %s1443_s12 = sphi %s1490_s12, %s1707_s12  }
   0x4   : > { %s1515_s18 = sadd.s32 1, %s1455_s15   ;;  %s91_s19 = sadd.s32 1, %s1451_s14 }
   0x5   : > { %s88_s20 = ssub.s32 %s1455_s15, %s1515_s18  ;;  %p101_p0 = scmp.ne.s32.totalorder %s1451_s14, %s1447_s13 }
   0x6   : > { %p89_p1 = scmp.eq.s32.totalorder %s88_s20, 0  ;;  %p102_p2 = scmp.eq.s32.totalorder %s1511_s16, 1 }
   0x7   : > { %p107_p3 = scmp.ne.s32.totalorder %s1447_s13, %s1443_s12  ;;  %p108_p4 = scmp.eq.s32.totalorder %s1224_s17, 1 }
   0x8   : > { %s1526_s21 = scalar_select %p89_p1, %s1451_s14, %s91_s19  }
   0x9   : > { %p1528_p5 = por %p102_p2, %p101_p0  ;;  %p1532_p6 = por %p108_p4, %p107_p3 }
   0xa   : > { %p1227_p7 = scmp.ge.s32.totalorder %s1455_s15, 1  ;;  %p140_p8 = scmp.lt.s32.totalorder %s1455_s15, 3 }
   0xc   : > { %p141_p9 = pnand %p1227_p7, %p140_p8 }
   0xd   : > { %p164_p10 = scmp.lt.s32.totalorder (!%p141_p9), %s1511_s16, 1  ;;  %s1461_s29 = smov (!%p141_p9), 127  }
   0xe   : > { %144 = sbr.rel (%p141_p9) target bundleno = 428 (0x1ac), region = 32  ;;  %s1462_s30 = smov (!%p141_p9), 126  }
   0xf   : > { %s1463_s4 = smov (!%p141_p9), 110   ;;  %s1464_s5 = smov (!%p141_p9), 109  }
  0x10   : > { %s1465_s6 = smov (!%p141_p9), 108   ;;  %s1466_s7 = smov (!%p141_p9), 92  }
  0x11   : > { %s1467_s8 = smov (!%p141_p9), 91   ;;  %s1468_s9 = smov (!%p141_p9), 90  }
  0x12   : > { %s161_s17 = sand.u32 (!%p141_p9), 1, %s1447_s13   ;;  %s1341_s20 = smul.u32 (!%p141_p9), 384, %s1511_s16 }
  0x13   : > { %v179_v0 = vlaneseq  ;;  %v1457_v1 = vmov 1983009808   ;;  %v1458_v3 = vmov 0.0   ;;  %s165_s24 = scalar_select %p164_p10, %s1511_s16, 1  ;;  %vm1459_vm0 = vmmov 0   ;;  %v1137_v13 = vld [vmem:[%s1703_s2] sm:$0xff] }
  0x14   : > { %v177_v2 = vunpack.c.l.s4 %v1457_v1  ;;  %1285 = vmatprep.subr.bf16.mxu1 %v1458_v3  ;;  %1287 = vmatprep.mubr.msk.bf16.mxu1 %vm1459_vm0, %v1458_v3  ;;  %v1460_v6 = vmov 0   ;;  %vm204_vm1 = vcmask 1041408   ;;  %vm197_vm2 = vcmask 1039360   ;;  %v1229_v18 = vld [vmem:[%s1702_s1 + $0x4] sm:$0xf]  ;;  %s1339_s19 = smul.u32 24, %s161_s17 }
  0x15   : > { %v180_v4 = vshrl.u32 %v179_v0, 7  ;;  %s1340_s25 = smul.u32 6, %s165_s24  ;;  %246 = vmatprep.mubr.bf16.mxu0 %v1460_v6  ;;  %1393 = vset.pattern.permute.xlu0 %v1460_v6  ;;  %vm200_vm3 = vcmask 31744   ;;  %vm396_vm4 = vcmask 1031168   ;;  %v171_v28 = vld [vmem:[%s1702_s1] sm:$0xf] }
  0x16   : > { %v178_v5 = vunpack.c.0.s8 %v177_v2  ;;  %vm503_vm5 = vcmask 900096   ;;  %v1236_v37 = vld [vmem:[%s1702_s1 + $0x8] sm:$0xf]  ;;  %vm610_vm6 = vcmask 891904   ;;  %v1240_v46 = vld [vmem:[%s1702_s1 + $0xc] sm:$0xf] }
  0x17   : > { %s168_s28 = scalar_lea.vmem %s1701_s0, %s1340_s25  ;;  %vm717_vm7 = vcmask 883712   ;;  %v1244_v54 = vld [vmem:[%s1702_s1 + $0x10] sm:$0xf]  ;;  %vm824_vm8 = vcmask 752640   ;;  %v1248_v62 = vld [vmem:[%s1702_s1 + $0x14] sm:$0xf] }
  0x18   : > { %v181_v7 = vsub.s32 %v178_v5, %v180_v4  ;;  %v170_v8 = vld [vmem:[%s168_s28] sm:$0x3f]  ;;  %vm931_vm9 = vcmask 744448   ;;  %vm1038_vm10 = vcmask 736256   ;;  %vm1148_vm11 = vcmask 244736   ;;  %s163_s24 = scalar_lea.vmem [#allocation2], %s1339_s19  ;;  %s1664_s28 = scalar_lea.hbm %s1704_s3, %s1341_s20 }
  0x19   : > { %v175_v10 = vcombine.high %v170_v8, %v170_v8  ;;  %s1165_s25 = sshll.u32 %s163_s24, 4  ;;  %s1151_s16 = scalar_lea.sflag [#allocation3], %s161_s17  ;;  %s1166_s25 = int_to_ptr.vmem [resolvable:$true] %s1165_s25 }
  0x1a   : > { %v182_v9 = vrot.slane %v170_v8, %v181_v7 }
  0x1b   : > { %v189_v11 = vrot.slane %v175_v10, %v181_v7  ;;  %v1252_v7 = vld [vmem:[%s1702_s1 + $0x18] sm:$0xf] }
  0x1c   : > { %191 = vrot.lane.b32.xlu0 %v182_v9, %s1461_s29  ;;  %v190_v12 = vcombine.high %v182_v9, %v182_v9  ;;  %v299_v24 = vsel %vm204_vm1, %v182_v9, 0 }
  0x1d   : > { %195 = vrot.lane.b32.xlu1 %v189_v11, %s1461_s29  ;;  %v305_v21 = vsel %vm204_vm1, %v189_v11, 0 }
  0x20   : > { %193 = vrot.lane.b32.xlu0 %v190_v12, %s1461_s29  ;;  %s1395_s29 = scalar_lea.vmem %s1166_s25, 384 }
  0x21   : > { %390 = vrot.lane.b32.xlu1 %v182_v9, %s1462_s30  ;;  %p1396_p11 = scmp.ne.s32.totalorder %s1166_s25, %s1395_s29 }
  0x23   : > { %p1397_p12 = pnand %p1396_p11, %p1528_p5 }
  0x24   : > { %392 = vrot.lane.b32.xlu0 %v190_v12, %s1462_s30 }
  0x25   : > { %394 = vrot.lane.b32.xlu1 %v189_v11, %s1462_s30  ;;  %p1398_p13 = pneg %p1397_p12  ;;  %s1469_s30 = smov [#allocation2]  }
  0x28   : > { %497 = vrot.lane.b32.xlu0 %v182_v9, %s1463_s4 }
  0x29   : > { %499 = vrot.lane.b32.xlu1 %v190_v12, %s1463_s4 }
  0x2c   : > { %501 = vrot.lane.b32.xlu0 %v189_v11, %s1463_s4  ;;  %s1399_s4 = sshll.u32 %s1469_s30, 4  ;;  %s1400_s4 = int_to_ptr.vmem [resolvable:$false] %s1399_s4 }
  0x2d   : > { %604 = vrot.lane.b32.xlu1 %v182_v9, %s1464_s5  ;;  %p1402_p0 = scmp.lt.s32.totalorder %s1166_s25, %s1400_s4 }
  0x30   : > { %606 = vrot.lane.b32.xlu0 %v190_v12, %s1464_s5 }
  0x31   : > { %608 = vrot.lane.b32.xlu1 %v189_v11, %s1464_s5  ;;  %s1401_s5 = scalar_lea.vmem %s1400_s4, 768 }
  0x32   : > { %p1403_p1 = scmp.lt.s32.totalorder %s1401_s5, %s1395_s29 }
  0x34   : > { %711 = vrot.lane.b32.xlu0 %v182_v9, %s1465_s6  ;;  %p1404_p2 = por %p1403_p1, %p1402_p0 }
  0x35   : > { %713 = vrot.lane.b32.xlu1 %v190_v12, %s1465_s6 }
  0x36   : > { %p1405_p3 = pnand %p1404_p2, %p1398_p13 }
  0x38   : > { %715 = vrot.lane.b32.xlu0 %v189_v11, %s1465_s6 }
  0x39   : > { %818 = vrot.lane.b32.xlu1 %v182_v9, %s1466_s7 }
  0x3c   : > { %820 = vrot.lane.b32.xlu0 %v190_v12, %s1466_s7 }
  0x3d   : > { %822 = vrot.lane.b32.xlu1 %v189_v11, %s1466_s7 }
  0x40   : > { %925 = vrot.lane.b32.xlu0 %v182_v9, %s1467_s8 }
  0x41   : > { %927 = vrot.lane.b32.xlu1 %v190_v12, %s1467_s8 }
  0x44   : > { %929 = vrot.lane.b32.xlu0 %v189_v11, %s1467_s8 }
  0x45   : > { %1032 = vrot.lane.b32.xlu1 %v182_v9, %s1468_s9 }
  0x48   : > { %1034 = vrot.lane.b32.xlu0 %v190_v12, %s1468_s9 }
  0x49   : > { %1036 = vrot.lane.b32.xlu1 %v189_v11, %s1468_s9 }
  0x4c   : > { %1140 = vperm.xlu0 %1393, %v1137_v13  }
  0x8e   : > { %v192_v14 = vpop.permute.xlu0 %191 }
  0x8f   : > { %v196_v15 = vpop.permute.xlu1 %195 }
  0x90   : > { %v212_v16 = vsel %vm204_vm1, %v196_v15, 0 }
  0x91   : > { %1286 = vmatpush3.bf16.msra.mxu1 %v212_v16 }
  0x92   : > { %v194_v17 = vpop.permute.xlu0 %193  ;;  %1291 = vmatprep.subr.bf16.mxu1 %v1458_v3 }
  0x93   : > { %v199_v19 = vsel %vm197_vm2, %v194_v17, %v196_v15  ;;  %v198_v20 = vsel %vm197_vm2, %v192_v14, %v194_v17  ;;  %v391_v23 = vpop.permute.xlu1 %390  ;;  %v1256_v14 = vld [vmem:[%s1702_s1 + $0x1c] sm:$0xf] }
  0x94   : > { %1230 = vmatprep.subr.msk.bf16.mxu0 %vm204_vm1, %v199_v19  ;;  %v206_v22 = vsel %vm204_vm1, %v198_v20, 0  ;;  %1288 = vmatmul.mubr.msk.bf16.vlgmr.msra.gmra.mxu1 %vm200_vm3, %v1229_v18 }
  0x95   : > { %229 = vmatpush1.bf16.msra.mxu0 %v206_v22  ;;  %1292 = vmatpush3.bf16.msra.mxu1 %v305_v21 }
  0x96   : > { %1233 = vmatprep.subr.msk.bf16.mxu0 %vm204_vm1, %v190_v12  ;;  %v393_v25 = vpop.permute.xlu0 %392  ;;  %1293 = vmatprep.mubr.msk.bf16.mxu1 %vm1459_vm0, %v1458_v3 }
  0x97   : > { %1297 = vmatprep.subr.bf16.mxu1 %v1458_v3  ;;  %v395_v26 = vpop.permute.xlu1 %394  ;;  %v397_v30 = vsel %vm396_vm4, %v391_v23, %v393_v25 }
  0x98   : > { %1231 = vmatmul.mubr.msk.bf16.vlgmr.msra.gmra.mxu0 %vm200_vm3, %v1229_v18  ;;  %v398_v27 = vsel %vm396_vm4, %v393_v25, %v395_v26  ;;  %v409_v31 = vsel %vm204_vm1, %v395_v26, 0  ;;  %v403_v33 = vsel %vm204_vm1, %v397_v30, 0  ;;  %v1260_v18 = vld [vmem:[%s1702_s1 + $0x20] sm:$0xf] }
  0x99   : > { %322 = vmatpush1.bf16.msra.mxu0 %v299_v24  ;;  %339 = vmatprep.mubr.bf16.mxu0 %v1460_v6 }
  0x9a   : > { %1237 = vmatprep.subr.msk.bf16.mxu0 %vm204_vm1, %v398_v27  ;;  %v498_v29 = vpop.permute.xlu0 %497 }
  0x9b   : > { %v500_v32 = vpop.permute.xlu1 %499 }
  0x9c   : > { %1294 = vmatmul.mubr.msk.bf16.vlgmr.msra.gmra.mxu1 %vm200_vm3, %v171_v28  ;;  %v504_v39 = vsel %vm503_vm5, %v498_v29, %v500_v32 }
  0x9d   : > { %1298 = vmatpush3.bf16.msra.mxu1 %v409_v31  ;;  %1299 = vmatprep.mubr.msk.bf16.mxu1 %vm1459_vm0, %v1458_v3  ;;  %v510_v42 = vsel %vm204_vm1, %v504_v39, 0 }
  0x9e   : > { %v502_v34 = vpop.permute.xlu0 %501  ;;  %1303 = vmatprep.subr.bf16.mxu1 %v1458_v3 }
  0x9f   : > { %v505_v35 = vsel %vm503_vm5, %v500_v32, %v502_v34  ;;  %v605_v36 = vpop.permute.xlu1 %604  ;;  %v516_v40 = vsel %vm204_vm1, %v502_v34, 0 }
  0xa0   : > { %1234 = vmatmul.mubr.msk.bf16.vlgmr.msra.gmra.mxu0 %vm200_vm3, %v171_v28 }
  0xa1   : > { %426 = vmatpush1.bf16.msra.mxu0 %v403_v33  ;;  %443 = vmatprep.mubr.bf16.mxu0 %v1460_v6 }
  0xa2   : > { %1241 = vmatprep.subr.msk.bf16.mxu0 %vm204_vm1, %v505_v35  ;;  %v607_v38 = vpop.permute.xlu0 %606 }
  0xa3   : > { %v609_v41 = vpop.permute.xlu1 %608  ;;  %v611_v47 = vsel %vm610_vm6, %v605_v36, %v607_v38 }
  0xa4   : > { %1300 = vmatmul.mubr.msk.bf16.vlgmr.msra.gmra.mxu1 %vm200_vm3, %v1236_v37  ;;  %v612_v44 = vsel %vm610_vm6, %v607_v38, %v609_v41  ;;  %v623_v48 = vsel %vm204_vm1, %v609_v41, 0  ;;  %v617_v50 = vsel %vm204_vm1, %v611_v47, 0 }
  0xa5   : > { %1304 = vmatpush3.bf16.msra.mxu1 %v516_v40  ;;  %1305 = vmatprep.mubr.msk.bf16.mxu1 %vm1459_vm0, %v1458_v3 }
  0xa6   : > { %v712_v43 = vpop.permute.xlu0 %711  ;;  %1309 = vmatprep.subr.bf16.mxu1 %v1458_v3 }
  0xa7   : > { %v714_v45 = vpop.permute.xlu1 %713 }
  0xa8   : > { %1238 = vmatmul.mubr.msk.bf16.vlgmr.msra.gmra.mxu0 %vm200_vm3, %v1236_v37  ;;  %v718_v55 = vsel %vm717_vm7, %v712_v43, %v714_v45 }
  0xa9   : > { %533 = vmatpush1.bf16.msra.mxu0 %v510_v42  ;;  %550 = vmatprep.mubr.bf16.mxu0 %v1460_v6  ;;  %v724_v58 = vsel %vm204_vm1, %v718_v55, 0 }
  0xaa   : > { %1245 = vmatprep.subr.msk.bf16.mxu0 %vm204_vm1, %v612_v44  ;;  %v716_v49 = vpop.permute.xlu0 %715 }
  0xab   : > { %v819_v51 = vpop.permute.xlu1 %818  ;;  %v719_v52 = vsel %vm717_vm7, %v714_v45, %v716_v49  ;;  %v730_v56 = vsel %vm204_vm1, %v716_v49, 0 }
  0xac   : > { %1306 = vmatmul.mubr.msk.bf16.vlgmr.msra.gmra.mxu1 %vm200_vm3, %v1240_v46 }
  0xad   : > { %1310 = vmatpush3.bf16.msra.mxu1 %v623_v48  ;;  %1311 = vmatprep.mubr.msk.bf16.mxu1 %vm1459_vm0, %v1458_v3 }
  0xae   : > { %1315 = vmatprep.subr.bf16.mxu1 %v1458_v3  ;;  %v821_v53 = vpop.permute.xlu0 %820 }
  0xaf   : > { %v823_v57 = vpop.permute.xlu1 %822  ;;  %v825_v63 = vsel %vm824_vm8, %v819_v51, %v821_v53 }
  0xb0   : > { %1242 = vmatmul.mubr.msk.bf16.vlgmr.msra.gmra.mxu0 %vm200_vm3, %v1240_v46  ;;  %v826_v60 = vsel %vm824_vm8, %v821_v53, %v823_v57  ;;  %v837_v0 = vsel %vm204_vm1, %v823_v57, 0  ;;  %v831_v2 = vsel %vm204_vm1, %v825_v63, 0 }
  0xb1   : > { %640 = vmatpush1.bf16.msra.mxu0 %v617_v50  ;;  %657 = vmatprep.mubr.bf16.mxu0 %v1460_v6 }
  0xb2   : > { %1249 = vmatprep.subr.msk.bf16.mxu0 %vm204_vm1, %v719_v52  ;;  %v926_v59 = vpop.permute.xlu0 %925 }
  0xb3   : > { %v928_v61 = vpop.permute.xlu1 %927 }
  0xb4   : > { %1312 = vmatmul.mubr.msk.bf16.vlgmr.msra.gmra.mxu1 %vm200_vm3, %v1244_v54  ;;  %v932_v8 = vsel %vm931_vm9, %v926_v59, %v928_v61 }
  0xb5   : > { %1316 = vmatpush3.bf16.msra.mxu1 %v730_v56  ;;  %1317 = vmatprep.mubr.msk.bf16.mxu1 %vm1459_vm0, %v1458_v3  ;;  %v938_v12 = vsel %vm204_vm1, %v932_v8, 0 }
  0xb6   : > { %1321 = vmatprep.subr.bf16.mxu1 %v1458_v3  ;;  %v930_v1 = vpop.permute.xlu0 %929 }
  0xb7   : > { %v1033_v4 = vpop.permute.xlu1 %1032  ;;  %v933_v5 = vsel %vm931_vm9, %v928_v61, %v930_v1  ;;  %v944_v9 = vsel %vm204_vm1, %v930_v1, 0 }
  0xb8   : > { %1246 = vmatmul.mubr.msk.bf16.vlgmr.msra.gmra.mxu0 %vm200_vm3, %v1244_v54 }
  0xb9   : > { %747 = vmatpush1.bf16.msra.mxu0 %v724_v58  ;;  %764 = vmatprep.mubr.bf16.mxu0 %v1460_v6 }
  0xba   : > { %1253 = vmatprep.subr.msk.bf16.mxu0 %vm204_vm1, %v826_v60  ;;  %v1035_v10 = vpop.permute.xlu0 %1034 }
  0xbb   : > { %v1037_v11 = vpop.permute.xlu1 %1036  ;;  %v1039_v15 = vsel %vm1038_vm10, %v1033_v4, %v1035_v10 }
  0xbc   : > { %1318 = vmatmul.mubr.msk.bf16.vlgmr.msra.gmra.mxu1 %vm200_vm3, %v1248_v62  ;;  %v1040_v13 = vsel %vm1038_vm10, %v1035_v10, %v1037_v11  ;;  %v1051_v16 = vsel %vm204_vm1, %v1037_v11, 0  ;;  %v1045_v17 = vsel %vm204_vm1, %v1039_v15, 0 }
  0xbd   : > { %1322 = vmatpush3.bf16.msra.mxu1 %v837_v0  ;;  %1323 = vmatprep.mubr.msk.bf16.mxu1 %vm1459_vm0, %v1458_v3 }
  0xbe   : > { %1327 = vmatprep.subr.bf16.mxu1 %v1458_v3 }
  0xc0   : > { %1250 = vmatmul.mubr.msk.bf16.vlgmr.msra.gmra.mxu0 %vm200_vm3, %v1248_v62 }
  0xc1   : > { %854 = vmatpush1.bf16.msra.mxu0 %v831_v2  ;;  %871 = vmatprep.mubr.bf16.mxu0 %v1460_v6 }
  0xc2   : > { %1257 = vmatprep.subr.msk.bf16.mxu0 %vm204_vm1, %v933_v5 }
  0xc4   : > { %1324 = vmatmul.mubr.msk.bf16.vlgmr.msra.gmra.mxu1 %vm200_vm3, %v1252_v7 }
  0xc5   : > { %1328 = vmatpush3.bf16.msra.mxu1 %v944_v9  ;;  %1329 = vmatprep.mubr.msk.bf16.mxu1 %vm1459_vm0, %v1458_v3 }
  0xc6   : > { %1333 = vmatprep.subr.bf16.mxu1 %v1458_v3 }
  0xc8   : > { %1254 = vmatmul.mubr.msk.bf16.vlgmr.msra.gmra.mxu0 %vm200_vm3, %v1252_v7 }
  0xc9   : > { %961 = vmatpush1.bf16.msra.mxu0 %v938_v12  ;;  %978 = vmatprep.mubr.bf16.mxu0 %v1460_v6 }
  0xca   : > { %1261 = vmatprep.subr.msk.bf16.mxu0 %vm204_vm1, %v1040_v13 }
  0xcc   : > { %1330 = vmatmul.mubr.msk.bf16.vlgmr.msra.gmra.mxu1 %vm200_vm3, %v1256_v14 }
  0xcd   : > { %1334 = vmatpush3.bf16.msra.mxu1 %v1051_v16  ;;  %1335 = vmatprep.mubr.msk.bf16.mxu1 %vm1459_vm0, %v1458_v3 }
  0xd0   : > { %1258 = vmatmul.mubr.msk.bf16.vlgmr.msra.gmra.mxu0 %vm200_vm3, %v1256_v14 }
  0xd1   : > { %1068 = vmatpush1.bf16.msra.mxu0 %v1045_v17  ;;  %1085 = vmatprep.mubr.bf16.mxu0 %v1460_v6 }
  0xd4   : > { %1336 = vmatmul.mubr.msk.bf16.vlgmr.msra.gmra.mxu1 %vm200_vm3, %v1260_v18 }
  0xd8   : > { %1262 = vmatmul.mubr.msk.bf16.vlgmr.msra.gmra.mxu0 %vm200_vm3, %v1260_v18 }
 0x154   : > { %v289_v19 = vpop.f32.mrf.mxu1 }
 0x156   : > { %v1289_v20 = vpop.f32.mrf.mxu1 }
 0x158   : > { %v248_v21 = vpop.f32.mrf.mxu0  ;;  %v292_v22 = vpop.f32.mrf.mxu1 }
 0x15a   : > { %v250_v23 = vpop.f32.mrf.mxu0  ;;  %v1290_v24 = vpop.f32.mrf.mxu1 }
 0x15c   : > { %v252_v3 = vpop.f32.mrf.mxu0  ;;  %v382_v25 = vpop.f32.mrf.mxu1 }
 0x15d   : > { %v383_v4 = vadd.f32 %v382_v25, %v289_v19 }
 0x15e   : > { %v253_v26 = vpop.f32.mrf.mxu0  ;;  %v1295_v27 = vpop.f32.mrf.mxu1 }
 0x160   : > { %v341_v28 = vpop.f32.mrf.mxu0  ;;  %v385_v6 = vpop.f32.mrf.mxu1 }
 0x161   : > { %v342_v10 = vadd.f32 %v341_v28, %v248_v21 }
 0x162   : > { %v343_v29 = vpop.f32.mrf.mxu0  ;;  %v1296_v30 = vpop.f32.mrf.mxu1 }
 0x163   : > { %v344_v14 = vadd.f32 %v343_v29, %v250_v23 }
 0x164   : > { %v345_v31 = vpop.f32.mrf.mxu0  ;;  %v486_v32 = vpop.f32.mrf.mxu1 }
 0x165   : > { %v494_v8 = vadd.f32 %v486_v32, %v383_v4 }
 0x166   : > { %v346_v33 = vpop.f32.mrf.mxu0  ;;  %v1301_v34 = vpop.f32.mrf.mxu1 }
 0x168   : > { %v445_v35 = vpop.f32.mrf.mxu0  ;;  %v489_v36 = vpop.f32.mrf.mxu1 }
 0x169   : > { %v492_v15 = vadd.f32 %v445_v35, %v342_v10  ;;  %v1141_v35 = vpop.permute.xlu0 %1140 }
 0x16a   : > { %v447_v37 = vpop.f32.mrf.mxu0  ;;  %v1302_v38 = vpop.f32.mrf.mxu1 }
 0x16b   : > { %v493_v20 = vadd.f32 %v447_v37, %v344_v14 }
 0x16c   : > { %v449_v39 = vpop.f32.mrf.mxu0  ;;  %v593_v40 = vpop.f32.mrf.mxu1 }
 0x16d   : > { %v601_v12 = vadd.f32 %v593_v40, %v494_v8 }
 0x16e   : > { %v450_v41 = vpop.f32.mrf.mxu0  ;;  %v1307_v42 = vpop.f32.mrf.mxu1 }
 0x170   : > { %v552_v43 = vpop.f32.mrf.mxu0  ;;  %v596_v44 = vpop.f32.mrf.mxu1 }
 0x171   : > { %v599_v22 = vadd.f32 %v552_v43, %v492_v15 }
 0x172   : > { %v554_v45 = vpop.f32.mrf.mxu0  ;;  %v1308_v46 = vpop.f32.mrf.mxu1 }
 0x173   : > { %v600_v25 = vadd.f32 %v554_v45, %v493_v20 }
 0x174   : > { %v556_v47 = vpop.f32.mrf.mxu0  ;;  %v700_v48 = vpop.f32.mrf.mxu1 }
 0x175   : > { %v708_v17 = vadd.f32 %v700_v48, %v601_v12 }
 0x176   : > { %v557_v49 = vpop.f32.mrf.mxu0  ;;  %v1313_v50 = vpop.f32.mrf.mxu1 }
 0x178   : > { %v659_v51 = vpop.f32.mrf.mxu0  ;;  %v703_v52 = vpop.f32.mrf.mxu1 }
 0x179   : > { %v706_v26 = vadd.f32 %v659_v51, %v599_v22 }
 0x17a   : > { %v661_v53 = vpop.f32.mrf.mxu0  ;;  %v1314_v54 = vpop.f32.mrf.mxu1 }
 0x17b   : > { %v707_v28 = vadd.f32 %v661_v53, %v600_v25 }
 0x17c   : > { %v663_v55 = vpop.f32.mrf.mxu0  ;;  %v807_v56 = vpop.f32.mrf.mxu1 }
 0x17d   : > { %v815_v3 = vadd.f32 %v807_v56, %v708_v17 }
 0x17e   : > { %v664_v57 = vpop.f32.mrf.mxu0  ;;  %v1319_v58 = vpop.f32.mrf.mxu1 }
 0x180   : > { %v766_v59 = vpop.f32.mrf.mxu0  ;;  %v810_v60 = vpop.f32.mrf.mxu1 }
 0x181   : > { %v813_v30 = vadd.f32 %v766_v59, %v706_v26 }
 0x182   : > { %v768_v61 = vpop.f32.mrf.mxu0  ;;  %v1320_v62 = vpop.f32.mrf.mxu1 }
 0x183   : > { %v814_v32 = vadd.f32 %v768_v61, %v707_v28 }
 0x184   : > { %v770_v63 = vpop.f32.mrf.mxu0  ;;  %v914_v0 = vpop.f32.mrf.mxu1 }
 0x185   : > { %v922_v6 = vadd.f32 %v914_v0, %v815_v3 }
 0x186   : > { %v771_v1 = vpop.f32.mrf.mxu0  ;;  %v1325_v2 = vpop.f32.mrf.mxu1 }
 0x188   : > { %v873_v5 = vpop.f32.mrf.mxu0  ;;  %v917_v7 = vpop.f32.mrf.mxu1 }
 0x189   : > { %v920_v33 = vadd.f32 %v873_v5, %v813_v30 }
 0x18a   : > { %v875_v9 = vpop.f32.mrf.mxu0  ;;  %v1326_v11 = vpop.f32.mrf.mxu1 }
 0x18b   : > { %v921_v38 = vadd.f32 %v875_v9, %v814_v32 }
 0x18c   : > { %v877_v13 = vpop.f32.mrf.mxu0  ;;  %v1021_v16 = vpop.f32.mrf.mxu1 }
 0x18d   : > { %v1029_v23 = vadd.f32 %v1021_v16, %v922_v6 }
 0x18e   : > { %v878_v18 = vpop.f32.mrf.mxu0  ;;  %v1331_v24 = vpop.f32.mrf.mxu1 }
 0x190   : > { %v980_v19 = vpop.f32.mrf.mxu0  ;;  %v1024_v27 = vpop.f32.mrf.mxu1 }
 0x191   : > { %v1027_v39 = vadd.f32 %v980_v19, %v920_v33 }
 0x192   : > { %v982_v21 = vpop.f32.mrf.mxu0  ;;  %v1332_v31 = vpop.f32.mrf.mxu1 }
 0x193   : > { %v1028_v43 = vadd.f32 %v982_v21, %v921_v38 }
 0x194   : > { %v984_v29 = vpop.f32.mrf.mxu0  ;;  %v1128_v34 = vpop.f32.mrf.mxu1 }
 0x195   : > { %v1136_v36 = vadd.f32 %v1128_v34, %v1029_v23 }
 0x196   : > { %v985_v37 = vpop.f32.mrf.mxu0  ;;  %v1337_v40 = vpop.f32.mrf.mxu1 }
 0x197   : > { %v1145_v41 = vadd.f32 %v1141_v35, %v1136_v36 }
 0x198   : > { %v1087_v42 = vpop.f32.mrf.mxu0  ;;  %v1131_v45 = vpop.f32.mrf.mxu1 }
 0x199   : > { %v1134_v44 = vadd.f32 %v1087_v42, %v1027_v39  ;;  %1149 = vst.msk [vmem:[%s163_s24 + $0x10] sm:$0xff] %vm1148_vm11, %v1145_v41 }
 0x19a   : > { %v1089_v46 = vpop.f32.mrf.mxu0  ;;  %v1338_v49 = vpop.f32.mrf.mxu1 }
 0x19b   : > { %v1143_v47 = vadd.f32 %v1141_v35, %v1134_v44  ;;  %v1135_v48 = vadd.f32 %v1089_v46, %v1028_v43 }
 0x19c   : > { %v1091_v50 = vpop.f32.mrf.mxu0 }
 0x19d   : > { %1146 = vst [vmem:[%s163_s24] sm:$0xff] %v1143_v47  ;;  %v1144_v51 = vadd.f32 %v1141_v35, %v1135_v48 }
 0x19e   : > { %v1092_v52 = vpop.f32.mrf.mxu0 }
 0x19f   : > { %1147 = vst [vmem:[%s163_s24 + $0x8] sm:$0xff] %v1144_v51 }
 0x1a0   : > { %1408 = shalt.err (!%p1405_p3)
}
 0x1a1   : > { %s1409_s6 = scalar_lea.hbm %s1664_s28, 384  ;;  %s1413_s9 = scalar_lea.hbm %s1704_s3, 768 }
 0x1a2   : > { %p1410_p4 = scmp.ne.s32.totalorder %s1664_s28, %s1409_s6  ;;  %p1414_p9 = scmp.lt.s32.totalorder %s1664_s28, %s1704_s3 }
 0x1a3   : > { %p1415_p10 = scmp.lt.s32.totalorder %s1413_s9, %s1409_s6 }
 0x1a4   : > { %p1411_p7 = pnand %p1410_p4, %p1528_p5 }
 0x1a5   : > { %p1416_p11 = por %p1415_p10, %p1414_p9 }
 0x1a6   : > { %p1412_p8 = pneg %p1411_p7 }
 0x1a8   : > { %p1417_p12 = pnand %p1416_p11, %p1412_p8 }
 0x1aa   : > { %1420 = shalt.err (!%p1417_p12)
}
 0x1ab   : > { %1342 = dma.vmem_to_hbm [thread:$0]  (%p1528_p5), %s1166_s25, 384, %s1664_s28, %s1151_s16  }
 0x1ac PF: > { %p1348_p13 = scmp.ge.s32.totalorder %s1455_s15, 2  ;;  %s1177_s17 = sand.u32 1, %s1443_s12  }
 0x1ad   : > { %s1178_s19 = scalar_lea.sflag [#allocation3], %s1177_s17 }
 0x1ae   : > { %p1345_p0 = pnand %p1348_p13, %p1532_p6 }
 0x1b0   : > { %p1346_p1 = pneg %p1345_p0 }
 0x1b2   : > { %1438 = dma.done.wait (%p1346_p1), %s1178_s19, 384  }
 0x1b3   : > { %1440 = vsyncadd (%p1346_p1), %s1178_s19, 4294966912  ;;  %p13_p2 = scmp.ge.s32.totalorder %s1515_s18, 4   ;;  %s1707_s12 = smov %s1447_s13 }
 0x1b4   : > { %s1708_s13 = smov %s1451_s14  ;;  %s1709_s14 = smov %s1526_s21 }
 0x1b5   : > { %s1710_s15 = smov %s1515_s18  ;;  %15 = sbr.rel (!%p13_p2) target bundleno = 3 (0x3), region = 75 }
 0x1ba   :  { %1183 = vsyncpa [#allocation3], 1 }
 0x1bb   :  { %1185 = vsyncpa [#allocation3 + $0x1], 1 }

</bundles_post_ra>
